<compile_context>
chip_gen: v7x
topology: tpu7x:2x2x1
jax: 0.10.0
libtpu: 0.0.40
codegen_flags: <defaults>
</compile_context>

<pallas_src>
import jax
import jax.numpy as jnp
from jax.experimental import pallas as pl
from jax.experimental.pallas import tpu as pltpu

NEGATIVE_SLOPE = 0.0   # plain ReLU
ALPHA_LOWER = 0.0      # alpha_lower for negative_slope == 0
ALPHA_UPPER = 1.0      # alpha_upper for negative_slope == 0

LANE_WIDTH = 1024      # lane-dense slab width (multiple of 128) -> unmasked vst
MAX_TILE_ROWS = 512    # (512, 1024) f32 tile = 2 MiB; 5 streams x 2 bufs = 20 MiB
VMEM_LIMIT_BYTES = 48 * 1024 * 1024   # fits v5e/v6e (128 MiB) and v7x (64 MiB)


def relu_transformer_kernel(l_ref, u_ref, alpha_ref, lb_ref, ub_ref):
    l = l_ref[...]
    u = u_ref[...]

    # Clamp.apply(alpha, alpha_lower, alpha_upper)
    alpha = jnp.clip(alpha_ref[...], ALPHA_LOWER, ALPHA_UPPER)

    one = jnp.ones_like(l)
    zero = jnp.zeros_like(l)

    # slope_upper = u / (u - l); guard degenerate u <= l (slope is only consumed
    # when l < 0 <= u, which implies u - l > 0, so the guard never changes results).
    denom = u - l
    safe_denom = jnp.where(denom > 0.0, denom, one)
    r = pl.reciprocal(safe_denom, approx=True)      # EUP slot -> ~free
    r = r * (2.0 - safe_denom * r)                  # one Newton step -> ~f32 precision
    slope_upper = u * r

    l_neg = l < 0.0
    u_nonneg = u >= 0.0

    # Diagonal relaxation weights via selects (no mask*build chains):
    #   u < 0           : 0
    #   u >= 0, l >= 0  : 1
    #   u >= 0, l <  0  : alpha (lower) / u/(u-l) (upper)
    w_l = jnp.where(u_nonneg, jnp.where(l_neg, alpha, one), zero)
    w_u = jnp.where(u_nonneg, jnp.where(l_neg, slope_upper, one), zero)

    # bias_upper only in the strictly-crossing case (l < 0 < u); bias_lower == 0.
    b_u = jnp.where(jnp.logical_and(l_neg, u > 0.0), -slope_upper * l, zero)

    # For ReLU (negative_slope == 0, alpha in [0,1], slope_upper >= 0) the diagonal
    # weights are non-negative, so the pos/neg weight split is dead code and the
    # bound propagation reduces to direct elementwise multiplies.
    lb_ref[...] = w_l * l
    ub_ref[...] = w_u * u + b_u


def relu_transformer_forward(lower_bound_prev, upper_bound_prev, alpha,
                             *, lane_width=LANE_WIDTH, max_tile_rows=MAX_TILE_ROWS):
    """Arbitrary-shaped bounds -> flattened lane-dense slab -> tiled Pallas kernel."""
    assert lower_bound_prev.shape == upper_bound_prev.shape == alpha.shape
    orig_shape = lower_bound_prev.shape
    dtype = lower_bound_prev.dtype

    n = lower_bound_prev.size
    C = lane_width
    rows = pl.cdiv(n, C)
    n_slab = rows * C

    if rows <= max_tile_rows:
        TR = rows                        # single row-tile == full dim (always legal)
    else:
        TR = max_tile_rows               # multiple of 8 -> (8,128)-aligned blocks
    grid_rows = pl.cdiv(rows, TR)        # ragged last tile handled by Pallas masking

    def prep(x):
        x = jnp.ravel(x)
        if n_slab != n:
            # zero padding: l=u=0 -> "both >= 0" branch, guarded denom -> no NaN.
            # Only needed when n is not a multiple of the lane width.
            x = jnp.pad(x, (0, n_slab - n))
        return x.reshape(rows, C)

    l2 = prep(lower_bound_prev)
    u2 = prep(upper_bound_prev)
    a2 = prep(alpha)

    spec = pl.BlockSpec((TR, C), lambda i: (i, 0))
    lb2, ub2 = pl.pallas_call(
        relu_transformer_kernel,
        grid=(grid_rows,),
        in_specs=[spec, spec, spec],
        out_specs=[spec, spec],
        out_shape=[
            jax.ShapeDtypeStruct((rows, C), dtype),
            jax.ShapeDtypeStruct((rows, C), dtype),
        ],
        compiler_params=pltpu.CompilerParams(
            # every row-tile is independent (pure elementwise) -> shard across
            # both TensorCores on v7x; no-op on v5e/v6e.
            dimension_semantics=("parallel",),
            vmem_limit_bytes=VMEM_LIMIT_BYTES,
        ),
    )(l2, u2, a2)

    if n_slab != n:
        lb = lb2.reshape(-1)[:n].reshape(orig_shape)
        ub = ub2.reshape(-1)[:n].reshape(orig_shape)
    else:
        lb = lb2.reshape(orig_shape)
        ub = ub2.reshape(orig_shape)
    return lb, ub


def _reference(l, u, alpha):
    """Pure-JAX reference of the same math (exact division, guarded denominator)."""
    alpha = jnp.clip(alpha, ALPHA_LOWER, ALPHA_UPPER)
    denom = u - l
    slope_u = jnp.where(denom > 0, u / jnp.where(denom > 0, denom, 1.0), 0.0)
    bn = jnp.logical_and(l < 0, u < 0).astype(l.dtype)
    bp = jnp.logical_and(l >= 0, u >= 0).astype(l.dtype)
    cr = jnp.logical_and(l < 0, u >= 0).astype(l.dtype)
    cs = jnp.logical_and(l < 0, u > 0).astype(l.dtype)
    w_l = bn * NEGATIVE_SLOPE + bp + cr * alpha
    w_u = bn * NEGATIVE_SLOPE + bp + cr * slope_u
    b_u = cs * (-slope_u * l)
    lb = jnp.maximum(w_l, 0) * l + jnp.minimum(w_l, 0) * u
    ub = jnp.maximum(w_u, 0) * u + jnp.minimum(w_u, 0) * l + b_u
    return lb, ub


if __name__ == "__main__":
    key = jax.random.PRNGKey(0)
    k1, k2, k3 = jax.random.split(key, 3)

    # Bounds for a small conv-style activation tensor: (batch=2, C=4, H=16, W=16)
    shape = (2, 4, 16, 16)
    a = jax.random.normal(k1, shape, dtype=jnp.float32)
    b = jax.random.normal(k2, shape, dtype=jnp.float32)
    lower_bound_prev = jnp.minimum(a, b) - 0.1    # guarantees upper > lower
    upper_bound_prev = jnp.maximum(a, b) + 0.1

    # alpha parameter (module init is ones*alpha_lower; here exercise the clamp +
    # crossing-case path with values outside [0,1] as well)
    alpha = jax.random.uniform(k3, shape, dtype=jnp.float32, minval=-0.5, maxval=1.5)

    lb, ub = relu_transformer_forward(lower_bound_prev, upper_bound_prev, alpha)
    jax.block_until_ready((lb, ub))

    # correctness checks against pure-JAX reference
    lb_ref, ub_ref = _reference(lower_bound_prev, upper_bound_prev, alpha)
    # lower bound does not involve the reciprocal -> tight tolerance
    assert jnp.allclose(lb, lb_ref, atol=1e-5, rtol=1e-5)
    # upper bound uses EUP reciprocal + one Newton step -> near f32 precision
    assert jnp.allclose(ub, ub_ref, atol=1e-4, rtol=1e-4)
    # invariant from the module's assert
    assert bool(jnp.any(upper_bound_prev >= lower_bound_prev))
    # output sanity: results are finite and upper >= lower
    assert bool(jnp.all(jnp.isfinite(lb))) and bool(jnp.all(jnp.isfinite(ub)))
    assert bool(jnp.all(ub >= lb - 1e-4))

    print("KERNEL_OK")
</pallas_src>

<mosaic_0001>
module attributes {stable_mosaic.version = 11 : i64} {
  func.func @relu_transformer_kernel(%arg0: i32, %arg1: memref<2x1024xf32, #tpu.memory_space<vmem>>, %arg2: memref<2x1024xf32, #tpu.memory_space<vmem>>, %arg3: memref<2x1024xf32, #tpu.memory_space<vmem>>, %arg4: memref<2x1024xf32, #tpu.memory_space<vmem>>, %arg5: memref<2x1024xf32, #tpu.memory_space<vmem>>) attributes {dimension_semantics = [#tpu.dimension_semantics<parallel>], iteration_bounds = array<i64: 1>, scalar_prefetch = 0 : i64, scratch_operands = 0 : i64, tpu.core_type = #tpu.core_type<tc>, window_params = [{transform_indices = @transform_0, window_bounds = array<i64: 2, 1024>}, {transform_indices = @transform_1, window_bounds = array<i64: 2, 1024>}, {transform_indices = @transform_2, window_bounds = array<i64: 2, 1024>}, {transform_indices = @transform_3, window_bounds = array<i64: 2, 1024>}, {transform_indices = @transform_4, window_bounds = array<i64: 2, 1024>}]} {
    %c0 = arith.constant 0 : index
    %c0_0 = arith.constant 0 : index
    %0 = vector.load %arg1[%c0, %c0_0] : memref<2x1024xf32, #tpu.memory_space<vmem>>, vector<2x1024xf32>
    %c0_1 = arith.constant 0 : index
    %c0_2 = arith.constant 0 : index
    %1 = vector.load %arg2[%c0_1, %c0_2] : memref<2x1024xf32, #tpu.memory_space<vmem>>, vector<2x1024xf32>
    %c0_3 = arith.constant 0 : index
    %c0_4 = arith.constant 0 : index
    %2 = vector.load %arg3[%c0_3, %c0_4] : memref<2x1024xf32, #tpu.memory_space<vmem>>, vector<2x1024xf32>
    %cst = arith.constant 0.000000e+00 : f32
    %cst_5 = arith.constant 1.000000e+00 : f32
    %3 = vector.broadcast %cst : f32 to vector<2x1024xf32>
    %4 = arith.maximumf %3, %2 : vector<2x1024xf32>
    %5 = vector.broadcast %cst_5 : f32 to vector<2x1024xf32>
    %6 = arith.minimumf %5, %4 : vector<2x1024xf32>
    %cst_6 = arith.constant 1.000000e+00 : f32
    %7 = vector.broadcast %cst_6 : f32 to vector<2x1024xf32>
    %cst_7 = arith.constant 0.000000e+00 : f32
    %8 = vector.broadcast %cst_7 : f32 to vector<2x1024xf32>
    %9 = arith.subf %1, %0 : vector<2x1024xf32>
    %cst_8 = arith.constant 0.000000e+00 : f32
    %10 = vector.broadcast %cst_8 : f32 to vector<2x1024xf32>
    %11 = arith.cmpf ogt, %9, %10 : vector<2x1024xf32>
    %12 = arith.select %11, %9, %7 : vector<2x1024xi1>, vector<2x1024xf32>
    %13 = tpu.reciprocal %12 {approx = true} : vector<2x1024xf32> -> vector<2x1024xf32>
    %14 = arith.mulf %12, %13 : vector<2x1024xf32>
    %cst_9 = arith.constant 2.000000e+00 : f32
    %15 = vector.broadcast %cst_9 : f32 to vector<2x1024xf32>
    %16 = arith.subf %15, %14 : vector<2x1024xf32>
    %17 = arith.mulf %13, %16 : vector<2x1024xf32>
    %18 = arith.mulf %1, %17 : vector<2x1024xf32>
    %cst_10 = arith.constant 0.000000e+00 : f32
    %19 = vector.broadcast %cst_10 : f32 to vector<2x1024xf32>
    %20 = arith.cmpf olt, %0, %19 : vector<2x1024xf32>
    %cst_11 = arith.constant 0.000000e+00 : f32
    %21 = vector.broadcast %cst_11 : f32 to vector<2x1024xf32>
    %22 = arith.cmpf oge, %1, %21 : vector<2x1024xf32>
    %23 = arith.select %20, %6, %7 : vector<2x1024xi1>, vector<2x1024xf32>
    %24 = arith.select %22, %23, %8 : vector<2x1024xi1>, vector<2x1024xf32>
    %25 = arith.select %20, %18, %7 : vector<2x1024xi1>, vector<2x1024xf32>
    %26 = arith.select %22, %25, %8 : vector<2x1024xi1>, vector<2x1024xf32>
    %cst_12 = arith.constant 0.000000e+00 : f32
    %27 = vector.broadcast %cst_12 : f32 to vector<2x1024xf32>
    %28 = arith.cmpf ogt, %1, %27 : vector<2x1024xf32>
    %29 = arith.andi %20, %28 : vector<2x1024xi1>
    %cst_13 = arith.constant 0.000000e+00 : f32
    %30 = vector.broadcast %cst_13 : f32 to vector<2x1024xf32>
    %31 = arith.subf %30, %18 : vector<2x1024xf32>
    %32 = arith.mulf %31, %0 : vector<2x1024xf32>
    %33 = arith.select %29, %32, %8 : vector<2x1024xi1>, vector<2x1024xf32>
    %34 = arith.mulf %24, %0 : vector<2x1024xf32>
    %c0_14 = arith.constant 0 : index
    %c0_15 = arith.constant 0 : index
    %35 = vector.load %arg4[%c0_14, %c0_15] : memref<2x1024xf32, #tpu.memory_space<vmem>>, vector<2x1024xf32>
    tpu.vector_store %arg4[%c0_14, %c0_15], %34 {strides = array<i32>} : memref<2x1024xf32, #tpu.memory_space<vmem>>, vector<2x1024xf32>,
    %36 = arith.mulf %26, %1 : vector<2x1024xf32>
    %37 = arith.addf %36, %33 : vector<2x1024xf32>
    %c0_16 = arith.constant 0 : index
    %c0_17 = arith.constant 0 : index
    %38 = vector.load %arg5[%c0_16, %c0_17] : memref<2x1024xf32, #tpu.memory_space<vmem>>, vector<2x1024xf32>
    tpu.vector_store %arg5[%c0_16, %c0_17], %37 {strides = array<i32>} : memref<2x1024xf32, #tpu.memory_space<vmem>>, vector<2x1024xf32>,
    return
  }
  func.func @transform_0(%arg0: i32) -> (i32, i32) {
    %c0_i32 = arith.constant 0 : i32
    %c0_i32_0 = arith.constant 0 : i32
    return %arg0, %c0_i32 : i32, i32
  }
  func.func @transform_1(%arg0: i32) -> (i32, i32) {
    %c0_i32 = arith.constant 0 : i32
    %c0_i32_0 = arith.constant 0 : i32
    return %arg0, %c0_i32 : i32, i32
  }
  func.func @transform_2(%arg0: i32) -> (i32, i32) {
    %c0_i32 = arith.constant 0 : i32
    %c0_i32_0 = arith.constant 0 : i32
    return %arg0, %c0_i32 : i32, i32
  }
  func.func @transform_3(%arg0: i32) -> (i32, i32) {
    %c0_i32 = arith.constant 0 : i32
    %c0_i32_0 = arith.constant 0 : i32
    return %arg0, %c0_i32 : i32, i32
  }
  func.func @transform_4(%arg0: i32) -> (i32, i32) {
    %c0_i32 = arith.constant 0 : i32
    %c0_i32_0 = arith.constant 0 : i32
    return %arg0, %c0_i32 : i32, i32
  }
}

</mosaic_0001>

<bundles_post_ra>
// kernel: tpu_custom_call.1
= control target key start
LH: loop header
LB: loop body
LE: loop exit
PB: predicated region body
PF: predicated region fallthrough
CT: control target
= control target key end

     0   :  { %10 = vsyncpa [#allocation3], 0  ;;  %s404_s0 = inlined_call_operand.hbm [shape: f32[2,1024], index: 0, kind: input, shape index: {}]   ;;  %s405_s1 = inlined_call_operand.hbm [shape: f32[2,1024], index: 1, kind: input, shape index: {}]   ;;  %s406_s2 = inlined_call_operand.hbm [shape: f32[2,1024], index: 2, kind: input, shape index: {}]   ;;  %s407_s3 = inlined_call_operand.hbm [shape: f32[2,1024], index: 3, kind: output, shape index: {0}]   ;;  %s408_s4 = inlined_call_operand.hbm [shape: f32[2,1024], index: 4, kind: output, shape index: {1}]  }
   0x1   :  { %11 = vsyncpa [#allocation6], 0 }
   0x2   :  { %12 = vsyncpa [#allocation4], 0 }
   0x3   :  { %13 = vsyncpa [#allocation10], 0  ;;  %s268_s15 = smov [#allocation5]   ;;  %s269_s17 = smov [#allocation2]  }
   0x4   :  { %s30_s16 = sshll.u32 %s268_s15, 4  ;;  %s20_s18 = sshll.u32 %s269_s17, 4  ;;  %s31_s16 = int_to_ptr.vmem [resolvable:$true] %s30_s16  ;;  %s21_s18 = int_to_ptr.vmem [resolvable:$true] %s20_s18 }
   0x5   :  { %s150_s21 = scalar_lea.hbm %s405_s1, 256 }
   0x6   :  { %p151_p0 = scmp.ne.s32.totalorder %s405_s1, %s150_s21  ;;  %p154_p1 = scmp.lt.u32.totalorder %s150_s21, %s405_s1 }
   0x8   :  { %p156_p2 = pnand %p154_p1, %p151_p0 }
   0xa   :  { %159 = shalt.err (!%p156_p2)
}
   0xb   :  { %s160_s26 = scalar_lea.vmem %s31_s16, 256  ;;  %p165_p4 = scmp.lt.s32.totalorder %s31_s16, %s31_s16 }
   0xc   :  { %p161_p3 = scmp.ne.s32.totalorder %s31_s16, %s160_s26  ;;  %p166_p5 = scmp.lt.s32.totalorder %s160_s26, %s160_s26 }
   0xe   :  { %p167_p6 = por %p166_p5, %p165_p4 }
  0x10   :  { %p168_p7 = pnand %p167_p6, %p161_p3 }
  0x12   :  { %171 = shalt.err (!%p168_p7)
}
  0x13   :  { %33 = dma.hbm_to_vmem [thread:$0]  %s405_s1, 256, %s31_s16, [#allocation6]  }
  0x14   :  { %s172_s5 = scalar_lea.hbm %s404_s0, 256 }
  0x15   :  { %p173_p8 = scmp.ne.s32.totalorder %s404_s0, %s172_s5  ;;  %p176_p9 = scmp.lt.u32.totalorder %s172_s5, %s404_s0 }
  0x17   :  { %p178_p10 = pnand %p176_p9, %p173_p8 }
  0x19   :  { %181 = shalt.err (!%p178_p10)
}
  0x1a   :  { %s182_s10 = scalar_lea.vmem %s21_s18, 256  ;;  %p187_p12 = scmp.lt.s32.totalorder %s21_s18, %s21_s18 }
  0x1b   :  { %p183_p11 = scmp.ne.s32.totalorder %s21_s18, %s182_s10  ;;  %p188_p13 = scmp.lt.s32.totalorder %s182_s10, %s182_s10 }
  0x1d   :  { %p189_p0 = por %p188_p13, %p187_p12 }
  0x1f   :  { %p190_p1 = pnand %p189_p0, %p183_p11 }
  0x21   :  { %193 = shalt.err (!%p190_p1)
}
  0x22   :  { %23 = dma.hbm_to_vmem [thread:$0]  %s404_s0, 256, %s21_s18, [#allocation3]  }
  0x23   :  { %s270_s12 = smov [#allocation7]   ;;  %s194_s16 = scalar_lea.hbm %s406_s2, 256 }
  0x24   :  { %s40_s13 = sshll.u32 %s270_s12, 4  ;;  %p195_p2 = scmp.ne.s32.totalorder %s406_s2, %s194_s16  ;;  %s41_s13 = int_to_ptr.vmem [resolvable:$true] %s40_s13 }
  0x25   :  { %p198_p3 = scmp.lt.u32.totalorder %s194_s16, %s406_s2 }
  0x27   :  { %p200_p4 = pnand %p198_p3, %p195_p2 }
  0x29   :  { %203 = shalt.err (!%p200_p4)
}
  0x2a   :  { %s204_s22 = scalar_lea.vmem %s41_s13, 256  ;;  %p209_p6 = scmp.lt.s32.totalorder %s41_s13, %s41_s13 }
  0x2b   :  { %p205_p5 = scmp.ne.s32.totalorder %s41_s13, %s204_s22  ;;  %p210_p7 = scmp.lt.s32.totalorder %s204_s22, %s204_s22 }
  0x2d   :  { %p211_p8 = por %p210_p7, %p209_p6 }
  0x2f   :  { %p212_p9 = pnand %p211_p8, %p205_p5 }
  0x31   :  { %215 = shalt.err (!%p212_p9)
}
  0x32   :  { %43 = dma.hbm_to_vmem [thread:$0]  %s406_s2, 256, %s41_s13, [#allocation6]  }
  0x33   :  { %260 = dma.done.wait [#allocation3], 256  }
  0x34   :  { %261 = vsyncadd [#allocation3], 4294967040 }
  0x35   :  { %262 = dma.done.wait [#allocation6], 512  }
  0x36   :  { %263 = vsyncadd [#allocation6], 4294966784  ;;  %v334_v0 = vld [vmem:[#allocation2] sm:$0xff]  ;;  %v336_v1 = vld [vmem:[#allocation5] sm:$0xff]  ;;  %s271_s2 = smov [#allocation8]  }
  0x37   :  { %v57_v2 = vld [vmem:[#allocation7] sm:$0xff]  ;;  %v63_v4 = vsub.f32 %v336_v1, %v334_v0  ;;  %v340_v5 = vld [vmem:[#allocation2 + $0x8] sm:$0xff]  ;;  %v342_v6 = vld [vmem:[#allocation5 + $0x8] sm:$0xff]  ;;  %vm79_vm1 = vcmp.lt.f32.partialorder %v334_v0, 0.0  ;;  %vm81_vm2 = vcmp.ge.f32.partialorder %v336_v1, 0.0  ;;  %s117_s23 = sshll.u32 %s271_s2, 4  ;;  %s118_s23 = int_to_ptr.vmem [resolvable:$true] %s117_s23 }
  0x38   :  { %v59_v3 = vmax.f32 %v57_v2, 0.0  ;;  %v58_v7 = vld [vmem:[#allocation7 + $0x8] sm:$0xff]  ;;  %v64_v9 = vsub.f32 %v342_v6, %v340_v5  ;;  %vm80_vm4 = vcmp.lt.f32.partialorder %v340_v5, 0.0  ;;  %vm82_vm5 = vcmp.ge.f32.partialorder %v342_v6, 0.0  ;;  %s216_s24 = scalar_lea.vmem %s118_s23, 256  ;;  %p221_p11 = scmp.lt.s32.totalorder %s118_s23, %s118_s23 }
  0x39   :  { %v60_v8 = vmax.f32 %v58_v7, 0.0  ;;  %vm65_vm0 = vcmp.gt.f32.partialorder %v63_v4, 0.0  ;;  %p217_p10 = scmp.ne.s32.totalorder %s118_s23, %s216_s24  ;;  %p222_p12 = scmp.lt.s32.totalorder %s216_s24, %s216_s24 }
  0x3a   :  { %v61_v10 = vmin.f32 %v59_v3, 1.0  ;;  %v67_v11 = vsel %vm65_vm0, %v63_v4, 1.0  ;;  %vm66_vm3 = vcmp.gt.f32.partialorder %v64_v9, 0.0 }
  0x3b   :  { %v62_v12 = vmin.f32 %v60_v8, 1.0  ;;  %146 = vrcp.f32 %v67_v11  ;;  %v68_v14 = vsel %vm66_vm3, %v64_v9, 1.0  ;;  %p223_p13 = por %p222_p12, %p221_p11 }
  0x3c   :  { %v83_v13 = vsel %vm79_vm1, %v61_v10, 1.0  ;;  %148 = vrcp.f32 %v68_v14 }
  0x3d   :  { %v85_v15 = vsel %vm81_vm2, %v83_v13, 0.0  ;;  %v84_v16 = vsel %vm80_vm4, %v62_v12, 1.0  ;;  %p224_p0 = pnand %p223_p13, %p217_p10 }
  0x3e   :  { %v101_v17 = vmul.f32 %v85_v15, %v334_v0  ;;  %v86_v18 = vsel %vm82_vm5, %v84_v16, 0.0 }
  0x3f   :  { %v102_v19 = vmul.f32 %v86_v18, %v340_v5 }
  0x40   :  { %103 = vst [vmem:[#allocation8] sm:$0xff] %v101_v17 }
  0x41   :  { %104 = vst [vmem:[#allocation8 + $0x8] sm:$0xff] %v102_v19 }
  0x42   :  { %227 = shalt.err (!%p224_p0)
}
  0x43   :  { %s228_s27 = scalar_lea.hbm %s407_s3, 256 }
  0x44   :  { %p229_p1 = scmp.ne.s32.totalorder %s407_s3, %s228_s27  ;;  %p232_p2 = scmp.lt.u32.totalorder %s228_s27, %s407_s3 }
  0x46   :  { %p234_p3 = pnand %p232_p2, %p229_p1 }
  0x48   :  { %237 = shalt.err (!%p234_p3)
}
  0x49   :  { %120 = dma.vmem_to_hbm [thread:$0]  %s118_s23, 256, %s407_s3, [#allocation4]   ;;  %v147_v20 = vpop.eup %146  ;;  %vm91_vm6 = vcmp.gt.f32.partialorder %v336_v1, 0.0  ;;  %vm92_vm7 = vcmp.gt.f32.partialorder %v342_v6, 0.0 }
  0x4a   :  { %v149_v21 = vpop.eup %148  ;;  %v71_v22 = vmul.f32 %v147_v20, %v67_v11  ;;  %vm93_vm8 = vmand %vm79_vm1, %vm91_vm6  ;;  %s272_s3 = smov [#allocation9]  }
  0x4b   :  { %v72_v23 = vmul.f32 %v149_v21, %v68_v14  ;;  %vm94_vm9 = vmand %vm80_vm4, %vm92_vm7  ;;  %s127_s8 = sshll.u32 %s272_s3, 4  ;;  %s128_s8 = int_to_ptr.vmem [resolvable:$true] %s127_s8 }
  0x4c   :  { %v73_v24 = vsub.f32 2.0, %v71_v22  ;;  %s238_s9 = scalar_lea.vmem %s128_s8, 256  ;;  %p243_p5 = scmp.lt.s32.totalorder %s128_s8, %s128_s8 }
  0x4d   :  { %v74_v25 = vsub.f32 2.0, %v72_v23  ;;  %p239_p4 = scmp.ne.s32.totalorder %s128_s8, %s238_s9  ;;  %p244_p6 = scmp.lt.s32.totalorder %s238_s9, %s238_s9 }
  0x4e   :  { %v75_v26 = vmul.f32 %v147_v20, %v73_v24 }
  0x4f   :  { %v76_v27 = vmul.f32 %v149_v21, %v74_v25  ;;  %p245_p7 = por %p244_p6, %p243_p5 }
  0x50   :  { %v77_v28 = vmul.f32 %v75_v26, %v336_v1 }
  0x51   :  { %v78_v29 = vmul.f32 %v76_v27, %v342_v6  ;;  %p246_p8 = pnand %p245_p7, %p239_p4 }
  0x52   :  { %v87_v30 = vsel %vm79_vm1, %v77_v28, 1.0  ;;  %v95_v31 = vsub.f32 0.0, %v77_v28 }
  0x53   :  { %v89_v32 = vsel %vm81_vm2, %v87_v30, 0.0  ;;  %v88_v33 = vsel %vm80_vm4, %v78_v29, 1.0  ;;  %v96_v34 = vsub.f32 0.0, %v78_v29 }
  0x54   :  { %v97_v35 = vmul.f32 %v95_v31, %v334_v0  ;;  %v105_v36 = vmul.f32 %v89_v32, %v336_v1  ;;  %v90_v37 = vsel %vm82_vm5, %v88_v33, 0.0 }
  0x55   :  { %v98_v38 = vmul.f32 %v96_v34, %v340_v5  ;;  %v106_v39 = vmul.f32 %v90_v37, %v342_v6 }
  0x56   :  { %v99_v40 = vsel %vm93_vm8, %v97_v35, 0.0 }
  0x57   :  { %v107_v41 = vadd.f32 %v105_v36, %v99_v40  ;;  %v100_v42 = vsel %vm94_vm9, %v98_v38, 0.0 }
  0x58   :  { %v108_v43 = vadd.f32 %v106_v39, %v100_v42 }
  0x59   :  { %109 = vst [vmem:[#allocation9] sm:$0xff] %v107_v41 }
  0x5a   :  { %110 = vst [vmem:[#allocation9 + $0x8] sm:$0xff] %v108_v43 }
  0x5b   :  { %249 = shalt.err (!%p246_p8)
}
  0x5c   :  { %s250_s11 = scalar_lea.hbm %s408_s4, 256 }
  0x5d   :  { %p251_p9 = scmp.ne.s32.totalorder %s408_s4, %s250_s11  ;;  %p254_p10 = scmp.lt.u32.totalorder %s250_s11, %s408_s4 }
  0x5f   :  { %p256_p11 = pnand %p254_p10, %p251_p9 }
  0x61   :  { %259 = shalt.err (!%p256_p11)
}
  0x62   :  { %130 = dma.vmem_to_hbm [thread:$0]  %s128_s8, 256, %s408_s4, [#allocation10]  }
  0x63   :  { %264 = dma.done.wait [#allocation4], 256  }
  0x64   :  { %265 = vsyncadd [#allocation4], 4294967040 }
  0x65   :  { %266 = dma.done.wait [#allocation10], 256  }
  0x66   :  { %267 = vsyncadd [#allocation10], 4294967040 }
  0x67   :  { %137 = vsyncpa [#allocation3], 1 }
  0x68   :  { %138 = vsyncpa [#allocation6], 1 }
  0x69   :  { %139 = vsyncpa [#allocation4], 1 }
  0x6a   :  { %140 = vsyncpa [#allocation10], 1 }

</bundles_post_ra>
